<compile_context>
chip_gen: v6e
topology: v6e:2x2x1
jax: 0.10.0
libtpu: 0.0.40
codegen_flags: <defaults>
</compile_context>

<pallas_src>
import functools

import jax
import jax.numpy as jnp
from jax import lax
from jax.experimental import pallas as pl
from jax.experimental.pallas import tpu as pltpu


# ---------------------------------------------------------------------------
# Prelude: per-in-feature DoRA scale = m / || W + lora_w * (A @ B).T ||_col
# Grid: (in tiles [parallel], out tiles [arbitrary reduction]).
# ---------------------------------------------------------------------------
def _scale_kernel(w_ref, a_ref, b_ref, m_ref, scale_ref, acc_ref, *, lora_w):
    ko = pl.program_id(1)

    @pl.when(ko == 0)
    def _():
        acc_ref[...] = jnp.zeros_like(acc_ref)

    # adapter tile directly in (out, in) layout: contract B(r, tout) with A(tin, r)
    # over r -> (tout, tin); no materialized transpose.
    adapter = lora_w * lax.dot_general(
        b_ref[...], a_ref[...],
        dimension_numbers=(((0,), (1,)), ((), ())),
        preferred_element_type=jnp.float32)
    wl = w_ref[...].astype(jnp.float32) + adapter            # (tout, tin)
    acc_ref[...] += jnp.sum(wl * wl, axis=0, keepdims=True)  # (1, tin)

    @pl.when(ko == pl.num_programs(1) - 1)
    def _():
        scale_ref[...] = m_ref[...].astype(jnp.float32) / jnp.sqrt(acc_ref[...])


def _compute_dora_scale(W, A, B, m, lora_w, *, tin=512, tout=128):
    out_f, in_f = W.shape
    rank = A.shape[1]

    tin = min(tin, in_f)
    if in_f % tin or (tin != in_f and tin % 128):
        tin = in_f
    tout = min(tout, out_f)
    if out_f % tout or (tout != out_f and tout % 128):
        tout = out_f

    grid = (in_f // tin, out_f // tout)
    kernel = functools.partial(_scale_kernel, lora_w=float(lora_w))

    return pl.pallas_call(
        kernel,
        out_shape=jax.ShapeDtypeStruct((1, in_f), jnp.float32),
        grid_spec=pltpu.PrefetchScalarGridSpec(
            num_scalar_prefetch=0,
            grid=grid,
            in_specs=[
                pl.BlockSpec((tout, tin), lambda jn, ko: (ko, jn)),   # W
                pl.BlockSpec((tin, rank), lambda jn, ko: (jn, 0)),    # A
                pl.BlockSpec((rank, tout), lambda jn, ko: (0, ko)),   # B
                pl.BlockSpec((1, tin), lambda jn, ko: (0, jn)),       # m
            ],
            out_specs=pl.BlockSpec((1, tin), lambda jn, ko: (0, jn)),
            scratch_shapes=[pltpu.VMEM((1, tin), jnp.float32)],
        ),
        compiler_params=pltpu.CompilerParams(
            dimension_semantics=("parallel", "arbitrary"),
            vmem_limit_bytes=32 * 1024 * 1024,
        ),
    )(W, A, B, m)


# ---------------------------------------------------------------------------
# Main kernel: tiled fused linear with low-rank correction.
# Grid: (batch tiles [parallel], out tiles [parallel], K tiles [arbitrary]).
# ---------------------------------------------------------------------------
def _dora_linear_kernel(scale_ref, x_ref, w_ref, a_ref, b_ref, bias_ref,
                        o_ref, acc_ref, xa_ref, *, lora_w):
    k = pl.program_id(2)

    @pl.when(k == 0)
    def _():
        acc_ref[...] = jnp.zeros_like(acc_ref)
        xa_ref[...] = jnp.zeros_like(xa_ref)

    # Scale the (tm, tk) x-tile instead of the (out, in) weight; keep the scale
    # math in f32, feed the MXU in the input dtype (bf16 inputs -> bf16 MXU).
    xs_f32 = x_ref[...].astype(jnp.float32) * scale_ref[...]
    xs = xs_f32.astype(x_ref.dtype)

    # acc += xs @ W_tile.T  (native nn.Linear MXU pattern, no explicit .T)
    acc_ref[...] += lax.dot_general(
        xs, w_ref[...],
        dimension_numbers=(((1,), (1,)), ((), ())),
        preferred_element_type=jnp.float32)

    # Low-rank partial: xa += xs @ A_tile  -> (tm, r); B applied once at the end.
    xa_ref[...] += jnp.dot(xs, a_ref[...], preferred_element_type=jnp.float32)

    @pl.when(k == pl.num_programs(2) - 1)
    def _():
        low_rank = jnp.dot(xa_ref[...], b_ref[...].astype(jnp.float32),
                           preferred_element_type=jnp.float32)
        y = acc_ref[...] + lora_w * low_rank + bias_ref[...].astype(jnp.float32)
        o_ref[...] = y.astype(o_ref.dtype)


def linear_dora(x, W, bias, A, B, m, lora_w: float = 1.0,
                *, tm: int = 256, tn: int = 256, tk: int = 512):
    """x: (batch, in), W: (out, in), bias: (out,), A: (in, r), B: (r, out), m: (1, in)."""
    batch, in_f = x.shape
    out_f, _ = W.shape
    rank = A.shape[1]

    # Clamp tiles to array dims; fall back to full extent where divisibility /
    # (8, 128) lane constraints would otherwise be violated.
    tm = min(tm, batch)
    if batch % tm or (tm != batch and tm % 8):
        tm = batch
    tn = min(tn, out_f)
    if out_f % tn or (tn != out_f and tn % 128):
        tn = out_f
    tk = min(tk, in_f)
    if in_f % tk or (tk != in_f and tk % 128):
        tk = in_f

    # Weight-only per-column scale, computed once (hoisted out of the hot loop).
    scale = _compute_dora_scale(W, A, B, m, lora_w)          # (1, in_f) f32
    bias2 = bias.reshape(1, out_f)

    grid = (batch // tm, out_f // tn, in_f // tk)
    kernel = functools.partial(_dora_linear_kernel, lora_w=float(lora_w))

    return pl.pallas_call(
        kernel,
        out_shape=jax.ShapeDtypeStruct((batch, out_f), x.dtype),
        grid_spec=pltpu.PrefetchScalarGridSpec(
            num_scalar_prefetch=0,
            grid=grid,
            in_specs=[
                pl.BlockSpec((1, tk), lambda i, j, k: (0, k)),      # scale
                pl.BlockSpec((tm, tk), lambda i, j, k: (i, k)),     # x
                pl.BlockSpec((tn, tk), lambda i, j, k: (j, k)),     # W
                pl.BlockSpec((tk, rank), lambda i, j, k: (k, 0)),   # A
                pl.BlockSpec((rank, tn), lambda i, j, k: (0, j)),   # B
                pl.BlockSpec((1, tn), lambda i, j, k: (0, j)),      # bias
            ],
            out_specs=pl.BlockSpec((tm, tn), lambda i, j, k: (i, j)),
            scratch_shapes=[
                pltpu.VMEM((tm, tn), jnp.float32),    # f32 accumulator
                pltpu.VMEM((tm, rank), jnp.float32),  # (x*scale) @ A partial
            ],
        ),
        compiler_params=pltpu.CompilerParams(
            dimension_semantics=("parallel", "parallel", "arbitrary"),
            vmem_limit_bytes=32 * 1024 * 1024,
        ),
    )(scale, x, W, A, B, bias2)


def linear_dora_ref(x, W, bias, A, B, m, lora_w: float = 1.0):
    adapter = lora_w * (A @ B).T
    weight_l = W + adapter
    direction = weight_l / jnp.linalg.norm(weight_l, axis=0, keepdims=True)
    weight_d = m * direction
    return x @ weight_d.T + bias


if __name__ == "__main__":
    # Shapes consistent with nn.Linear(in_features=256, out_features=256), rank-4 LoRA.
    batch, in_f, out_f, rank = 256, 256, 256, 4
    lora_w = 1.0

    key = jax.random.PRNGKey(0)
    k_x, k_w, k_b, k_A, k_B = jax.random.split(key, 5)

    x = jax.random.normal(k_x, (batch, in_f), dtype=jnp.float32)
    W = jax.random.normal(k_w, (out_f, in_f), dtype=jnp.float32) * 0.1
    bias = jax.random.normal(k_b, (out_f,), dtype=jnp.float32) * 0.1
    A = jax.random.normal(k_A, (in_f, rank), dtype=jnp.float32) * 0.1
    B = jax.random.normal(k_B, (rank, out_f), dtype=jnp.float32) * 0.1
    # m initialised as in __init__: column-wise L2 norm of the frozen weight.
    m = jnp.linalg.norm(W, axis=0, keepdims=True)  # (1, in_f)

    # Small tiles here so the demo exercises multi-step (M, N, K) pipelining;
    # defaults (256/256/512) are the production-sized tiles.
    out = linear_dora(x, W, bias, A, B, m, lora_w, tm=128, tn=128, tk=128)
    out = jax.block_until_ready(out)

    ref = linear_dora_ref(x, W, bias, A, B, m, lora_w)
    assert out.shape == (batch, out_f)
    assert jnp.allclose(out, ref, atol=1e-4, rtol=1e-4), "mismatch vs reference"

    print("KERNEL_OK")
</pallas_src>

<mosaic_0001>
module attributes {stable_mosaic.version = 11 : i64} {
  func.func @_scale_kernel(%arg0: i32, %arg1: i32, %arg2: memref<128x256xf32, #tpu.memory_space<vmem>>, %arg3: memref<256x4xf32, #tpu.memory_space<vmem>>, %arg4: memref<4x128xf32, #tpu.memory_space<vmem>>, %arg5: memref<1x256xf32, #tpu.memory_space<vmem>>, %arg6: memref<1x256xf32, #tpu.memory_space<vmem>>, %arg7: memref<1x256xf32, #tpu.memory_space<vmem>>) attributes {dimension_semantics = [#tpu.dimension_semantics<parallel>, #tpu.dimension_semantics<arbitrary>], iteration_bounds = array<i64: 1, 2>, scalar_prefetch = 0 : i64, scratch_operands = 1 : i64, tpu.core_type = #tpu.core_type<tc>, window_params = [{transform_indices = @transform_0, window_bounds = array<i64: 128, 256>}, {transform_indices = @transform_1, window_bounds = array<i64: 256, 4>}, {transform_indices = @transform_2, window_bounds = array<i64: 4, 128>}, {transform_indices = @transform_3, window_bounds = array<i64: 1, 256>}, {transform_indices = @transform_4, window_bounds = array<i64: 1, 256>}]} {
    %c0_i32 = arith.constant 0 : i32
    %0 = arith.cmpi eq, %arg1, %c0_i32 : i32
    %1 = arith.extui %0 : i1 to i32
    %c0_i32_0 = arith.constant 0 : i32
    %2 = arith.cmpi ne, %1, %c0_i32_0 : i32
    scf.if %2 {
      %cst_13 = arith.constant 0.000000e+00 : f32
      %19 = vector.broadcast %cst_13 : f32 to vector<1x256xf32>
      %c0_14 = arith.constant 0 : index
      %c0_15 = arith.constant 0 : index
      %20 = vector.load %arg7[%c0_14, %c0_15] : memref<1x256xf32, #tpu.memory_space<vmem>>, vector<1x256xf32>
      tpu.vector_store %arg7[%c0_14, %c0_15], %19 {strides = array<i32>} : memref<1x256xf32, #tpu.memory_space<vmem>>, vector<1x256xf32>,
    } else {
    }
    %c0 = arith.constant 0 : index
    %c0_1 = arith.constant 0 : index
    %3 = vector.load %arg4[%c0, %c0_1] : memref<4x128xf32, #tpu.memory_space<vmem>>, vector<4x128xf32>
    %c0_2 = arith.constant 0 : index
    %c0_3 = arith.constant 0 : index
    %4 = vector.load %arg3[%c0_2, %c0_3] : memref<256x4xf32, #tpu.memory_space<vmem>>, vector<256x4xf32>
    %cst = arith.constant dense<0.000000e+00> : vector<128x256xf32>
    %5 = tpu.matmul %3, %4, %cst {dimension_numbers = #tpu.dot_dimension_numbers<[0], [1], [1], [0], [0, 1, 1, 0], [], []>} : vector<4x128xf32>, vector<256x4xf32>, vector<128x256xf32> -> vector<128x256xf32>
    %cst_4 = arith.constant 1.000000e+00 : f32
    %6 = vector.broadcast %cst_4 : f32 to vector<128x256xf32>
    %7 = arith.mulf %6, %5 : vector<128x256xf32>
    %c0_5 = arith.constant 0 : index
    %c0_6 = arith.constant 0 : index
    %8 = vector.load %arg2[%c0_5, %c0_6] : memref<128x256xf32, #tpu.memory_space<vmem>>, vector<128x256xf32>
    %9 = arith.addf %8, %7 : vector<128x256xf32>
    %c0_7 = arith.constant 0 : index
    %c0_8 = arith.constant 0 : index
    %10 = vector.load %arg7[%c0_7, %c0_8] : memref<1x256xf32, #tpu.memory_space<vmem>>, vector<1x256xf32>
    %11 = arith.mulf %9, %9 : vector<128x256xf32>
    %cst_9 = arith.constant dense<0.000000e+00> : vector<256xf32>
    %12 = vector.multi_reduction <add>, %11, %cst_9 [0] : vector<128x256xf32> to vector<256xf32>
    %13 = vector.shape_cast %12 : vector<256xf32> to vector<1x256xf32>
    %14 = arith.addf %10, %13 : vector<1x256xf32>
    %c0_10 = arith.constant 0 : index
    %c0_11 = arith.constant 0 : index
    %15 = vector.load %arg7[%c0_10, %c0_11] : memref<1x256xf32, #tpu.memory_space<vmem>>, vector<1x256xf32>
    tpu.vector_store %arg7[%c0_10, %c0_11], %14 {strides = array<i32>} : memref<1x256xf32, #tpu.memory_space<vmem>>, vector<1x256xf32>,
    %c1_i32 = arith.constant 1 : i32
    %16 = arith.cmpi eq, %arg1, %c1_i32 : i32
    %17 = arith.extui %16 : i1 to i32
    %c0_i32_12 = arith.constant 0 : i32
    %18 = arith.cmpi ne, %17, %c0_i32_12 : i32
    scf.if %18 {
      %c0_13 = arith.constant 0 : index
      %c0_14 = arith.constant 0 : index
      %19 = vector.load %arg5[%c0_13, %c0_14] : memref<1x256xf32, #tpu.memory_space<vmem>>, vector<1x256xf32>
      %c0_15 = arith.constant 0 : index
      %c0_16 = arith.constant 0 : index
      %20 = vector.load %arg7[%c0_15, %c0_16] : memref<1x256xf32, #tpu.memory_space<vmem>>, vector<1x256xf32>
      %21 = math.sqrt %20 : vector<1x256xf32>
      %22 = arith.divf %19, %21 : vector<1x256xf32>
      %c0_17 = arith.constant 0 : index
      %c0_18 = arith.constant 0 : index
      %23 = vector.load %arg6[%c0_17, %c0_18] : memref<1x256xf32, #tpu.memory_space<vmem>>, vector<1x256xf32>
      tpu.vector_store %arg6[%c0_17, %c0_18], %22 {strides = array<i32>} : memref<1x256xf32, #tpu.memory_space<vmem>>, vector<1x256xf32>,
    } else {
    }
    return
  }
  func.func @transform_0(%arg0: i32, %arg1: i32) -> (i32, i32) {
    %c0_i32 = arith.constant 0 : i32
    return %arg1, %arg0 : i32, i32
  }
  func.func @transform_1(%arg0: i32, %arg1: i32) -> (i32, i32) {
    %c0_i32 = arith.constant 0 : i32
    %c0_i32_0 = arith.constant 0 : i32
    return %arg0, %c0_i32 : i32, i32
  }
  func.func @transform_2(%arg0: i32, %arg1: i32) -> (i32, i32) {
    %c0_i32 = arith.constant 0 : i32
    %c0_i32_0 = arith.constant 0 : i32
    return %c0_i32, %arg1 : i32, i32
  }
  func.func @transform_3(%arg0: i32, %arg1: i32) -> (i32, i32) {
    %c0_i32 = arith.constant 0 : i32
    %c0_i32_0 = arith.constant 0 : i32
    return %c0_i32, %arg0 : i32, i32
  }
  func.func @transform_4(%arg0: i32, %arg1: i32) -> (i32, i32) {
    %c0_i32 = arith.constant 0 : i32
    %c0_i32_0 = arith.constant 0 : i32
    return %c0_i32, %arg0 : i32, i32
  }
}

</mosaic_0001>

<bundles_post_ra>
// kernel: tpu_custom_call.1
= control target key start
LH: loop header
LB: loop body
LE: loop exit
PB: predicated region body
PF: predicated region fallthrough
CT: control target
= control target key end

     0   :  { %9 = vsyncpa [#allocation4], 0  ;;  %s1687_s0 = inlined_call_operand.hbm [shape: f32[256,256], index: 0, kind: input, shape index: {}]   ;;  %s1688_s1 = inlined_call_operand.vmem [shape: f32[256,4], index: 1, kind: input, shape index: {}]   ;;  %s1689_s2 = inlined_call_operand.vmem [shape: f32[4,256], index: 2, kind: input, shape index: {}]   ;;  %s1690_s3 = inlined_call_operand.vmem [shape: f32[1,256], index: 3, kind: input, shape index: {}]   ;;  %s1691_s4 = inlined_call_operand.hbm [shape: f32[1,256], index: 4, kind: output, shape index: {}]  }
   0x1   :  { %11 = vsyncpa [#allocation4 + $0x1], 0 }
   0x2   :  { %12 = vsyncpa [#allocation5], 0  ;;  %s1333_s15 = smov 0   ;;  %s1335_s16 = smov 0  }
   0x3   :  { %s1337_s17 = smov 0   ;;  %s1339_s18 = smov 0  }
   0x4   :  { %s1341_s19 = smov 0   ;;  %s1343_s20 = smov 0  }
   0x5 LB: > { %s959_s21 = sadd.s32 4294967295, %s1300_s20   ;;  %s27_s22 = sadd.s32 1, %s1296_s19  ;;  %s1300_s20 = sphi %s1343_s20, %s18_s20   ;;  %s1296_s19 = sphi %s1341_s19, %s1702_s19   ;;  %s1292_s18 = sphi %s1339_s18, %s1701_s18   ;;  %s1288_s17 = sphi %s1337_s17, %s1700_s17   ;;  %s1284_s16 = sphi %s1335_s16, %s1699_s16   ;;  %s1280_s15 = sphi %s1333_s15, %s1698_s15  }
   0x6   : > { %p28_p0 = scmp.ge.s32.totalorder %s27_s22, 2  ;;  %s39_s23 = sadd.s32 1, %s1288_s17 }
   0x7   : > { %p46_p1 = scmp.ne.s32.totalorder %s1288_s17, %s1284_s16  ;;  %p47_p2 = scmp.eq.s32.totalorder %s1300_s20, 0 }
   0x8   : > { %s1704_s22 = smov (%p28_p0, %s27_s22), 0  ;;  %p52_p4 = scmp.ne.s32.totalorder %s1284_s16, %s1280_s15 }
   0x9   : > { %p1369_p3 = por %p47_p2, %p46_p1  ;;  %s34_s25 = ssub.s32 %s1296_s19, %s1704_s22 }
   0xa   : > { %p53_p5 = scmp.eq.s32.totalorder %s959_s21, 0  ;;  %p37_p6 = scmp.eq.s32.totalorder %s34_s25, 0 }
   0xb   : > { %p1133_p8 = scmp.lt.s32.totalorder %s1300_s20, 2  ;;  %s197_s28 = sand.u32 1, %s1288_s17  }
   0xc   : > { %p1378_p7 = por %p53_p5, %p52_p4  ;;  %s1026_s29 = sshll.u32 %s1296_s19, 12 }
   0xd   : > { %s1384_s27 = scalar_select %p37_p6, %s1288_s17, %s39_s23  }
   0xe   : > { %s964_s30 = sshll.u32 %s197_s28, 8  ;;  %s210_s7 = scalar_lea.hbm %s1687_s0, %s1026_s29 }
   0xf   : > { %s201_s8 = scalar_lea.vmem [#allocation3], %s964_s30  ;;  %p1393_p9 = pnand %p1133_p8, %p1369_p3 }
  0x10   : > { %s211_s9 = sshll.u32 %s201_s8, 4  ;;  %s198_s11 = scalar_lea.sflag [#allocation4], %s197_s28  ;;  %s212_s9 = int_to_ptr.vmem [resolvable:$true] %s211_s9 }
  0x11   : > { %p1196_p10 = pneg %p1393_p9  ;;  %s1207_s12 = scalar_lea.vmem %s212_s9, 4096 }
  0x12   : > { %p1208_p11 = scmp.ne.s32.totalorder %s212_s9, %s1207_s12  ;;  %s1302_s13 = smov [#allocation3]  }
  0x13   : > { %s1212_s14 = sshll.u32 %s1302_s13, 4  ;;  %s1213_s14 = int_to_ptr.vmem [resolvable:$false] %s1212_s14 }
  0x14   : > { %p1210_p12 = pnand %p1208_p11, %p1196_p10  ;;  %s1214_s15 = scalar_lea.vmem %s1213_s14, 8192 }
  0x15   : > { %p1215_p0 = scmp.lt.s32.totalorder %s212_s9, %s1213_s14  ;;  %p1216_p1 = scmp.lt.s32.totalorder %s1214_s15, %s1207_s12 }
  0x16   : > { %p1211_p13 = pneg %p1210_p12 }
  0x17   : > { %p1217_p2 = por %p1216_p1, %p1215_p0 }
  0x19   : > { %p1218_p3 = pnand %p1217_p2, %p1211_p13 }
  0x1b   : > { %1221 = shalt.err (!%p1218_p3)
}
  0x1c   : > { %s1303_s23 = smov 256   ;;  %s1304_s24 = smov 16  }
  0x1d   : > { %1132 = dma.hbm_to_vmem [thread:$0]  (!%p1393_p9), %s210_s7, 4096, %s212_s9, %s198_s11, %s1303_s23, %s1303_s23, %s1304_s24  }
  0x1e   : > { %p968_p4 = scmp.ge.s32.totalorder %s1300_s20, 1  ;;  %p226_p5 = scmp.lt.s32.totalorder %s1300_s20, 3 }
  0x20   : > { %p227_p6 = pnand %p968_p4, %p226_p5 }
  0x21   : > { %s232_s25 = sand.u32 (!%p227_p6), 1, %s1284_s16  }
  0x22   : > { %230 = sbr.rel (%p227_p6) target bundleno = 518 (0x206), region = 36  ;;  %s969_s28 = sshll.u32 (!%p227_p6), %s232_s25, 8 }
  0x23   : > { %s233_s29 = scalar_lea.sflag (!%p227_p6), [#allocation4], %s232_s25  ;;  %s1404_s30 = scalar_lea.vmem (!%p227_p6), [#allocation3], %s969_s28 }
  0x27   : > { %1271 = dma.done.wait (%p1378_p7), %s233_s29, 4096  }
  0x28   : > { %1273 = vsyncadd (%p1378_p7), %s233_s29, 4294963200  ;;  %p277_p8 = scmp.lt.s32.totalorder %s1292_s18, 1  ;;  %p971_p9 = scmp.ne.s32.totalorder %s1292_s18, 0 }
  0x2a   : > { %s278_s5 = scalar_select %p277_p8, %s1292_s18, 1 }
  0x2b   : > { %290 = sbr.rel (%p971_p9) target bundleno = 52 (0x34), region = 44 }
  0x2c   : > { %s970_s6 = sshll.u32 %s278_s5, 2 }
  0x2d   : > { %s280_s9 = scalar_lea.vmem %s1689_s2, %s970_s6 }
  0x30   : > { %v291_v0 = vlaneseq  ;;  %v1305_v1 = vmov 0.0  }
  0x32   : > { %vm293_vm0 = vcmp.lt.s32.totalorder %v291_v0, 256 }
  0x33   : > { %295 = vst.msk [vmem:[#allocation2] sm:$0x3] %vm293_vm0, %v1305_v1 }
  0x34 PF: > { %v296_v2 = vld [vmem:[%s280_s9] sm:$0xf]  ;;  %v328_v3 = vld [vmem:[%s1688_s1 + $0xf8] sm:$0xff]  ;;  %vm361_vm1 = vcmask 31744   ;;  %v327_v5 = vld [vmem:[%s1688_s1 + $0xf0] sm:$0xff]  ;;  %p1020_p7 = scmp.ne.s32.totalorder %s1292_s18, 1 }
  0x35   : > { %v312_v4 = vld [vmem:[%s1688_s1 + $0x78] sm:$0xff]  ;;  %329 = vxpose.xlu0.b32.start.end [1/1] (short) %v296_v2, 128  ;;  %1027 = vmatprep.subr.msk.mxu0 %vm361_vm1, %v328_v3  ;;  %v311_v6 = vld [vmem:[%s1688_s1 + $0x70] sm:$0xff]  ;;  %v326_v7 = vld [vmem:[%s1688_s1 + $0xe8] sm:$0xff] }
  0x36   : > { %1028 = vmatpush3.xpose.msk.msra.mxu0 %vm361_vm1, %v312_v4  ;;  %1091 = vmatprep.subr.msk.mxu1 %vm361_vm1, %v328_v3  ;;  %v310_v8 = vld [vmem:[%s1688_s1 + $0x68] sm:$0xff]  ;;  %v325_v9 = vld [vmem:[%s1688_s1 + $0xe0] sm:$0xff]  ;;  %v324_v11 = vld [vmem:[%s1688_s1 + $0xd8] sm:$0xff] }
  0x37   : > { %1029 = vmatprep.subr.msk.mxu0 %vm361_vm1, %v327_v5  ;;  %1107 = vmatpush3.xpose.msk.msra.mxu1 %vm361_vm1, %v312_v4  ;;  %v309_v10 = vld [vmem:[%s1688_s1 + $0x60] sm:$0xff]  ;;  %v308_v12 = vld [vmem:[%s1688_s1 + $0x58] sm:$0xff]  ;;  %v323_v13 = vld [vmem:[%s1688_s1 + $0xd0] sm:$0xff] }
  0x38   : > { %1092 = vmatprep.subr.msk.mxu1 %vm361_vm1, %v327_v5  ;;  %v307_v14 = vld [vmem:[%s1688_s1 + $0x50] sm:$0xff]  ;;  %v322_v15 = vld [vmem:[%s1688_s1 + $0xc8] sm:$0xff]  ;;  %v321_v17 = vld [vmem:[%s1688_s1 + $0xc0] sm:$0xff] }
  0x39   : > { %v306_v16 = vld [vmem:[%s1688_s1 + $0x48] sm:$0xff]  ;;  %v305_v18 = vld [vmem:[%s1688_s1 + $0x40] sm:$0xff]  ;;  %v320_v19 = vld [vmem:[%s1688_s1 + $0xb8] sm:$0xff] }
  0x3a   : > { %1030 = vmatpush3.xpose.msk.msra.mxu0 %vm361_vm1, %v311_v6  ;;  %v304_v20 = vld [vmem:[%s1688_s1 + $0x38] sm:$0xff]  ;;  %v319_v21 = vld [vmem:[%s1688_s1 + $0xb0] sm:$0xff]  ;;  %v318_v23 = vld [vmem:[%s1688_s1 + $0xa8] sm:$0xff] }
  0x3b   : > { %1031 = vmatprep.subr.msk.mxu0 %vm361_vm1, %v326_v7  ;;  %1108 = vmatpush3.xpose.msk.msra.mxu1 %vm361_vm1, %v311_v6  ;;  %v303_v22 = vld [vmem:[%s1688_s1 + $0x30] sm:$0xff]  ;;  %v302_v24 = vld [vmem:[%s1688_s1 + $0x28] sm:$0xff]  ;;  %v317_v25 = vld [vmem:[%s1688_s1 + $0xa0] sm:$0xff] }
  0x3c   : > { %1093 = vmatprep.subr.msk.mxu1 %vm361_vm1, %v326_v7  ;;  %v301_v26 = vld [vmem:[%s1688_s1 + $0x20] sm:$0xff]  ;;  %v316_v27 = vld [vmem:[%s1688_s1 + $0x98] sm:$0xff]  ;;  %v315_v29 = vld [vmem:[%s1688_s1 + $0x90] sm:$0xff] }
  0x3d   : > { %v300_v28 = vld [vmem:[%s1688_s1 + $0x18] sm:$0xff]  ;;  %v299_v30 = vld [vmem:[%s1688_s1 + $0x10] sm:$0xff]  ;;  %v314_v31 = vld [vmem:[%s1688_s1 + $0x88] sm:$0xff] }
  0x3e   : > { %1032 = vmatpush3.xpose.msk.msra.mxu0 %vm361_vm1, %v310_v8  ;;  %v298_v32 = vld [vmem:[%s1688_s1 + $0x8] sm:$0xff]  ;;  %v313_v33 = vld [vmem:[%s1688_s1 + $0x80] sm:$0xff]  ;;  %v669_v63 = vld [vmem:[%s1404_s30 + $0x10] sm:$0xff] }
  0x3f   : > { %1033 = vmatprep.subr.msk.mxu0 %vm361_vm1, %v325_v9  ;;  %1109 = vmatpush3.xpose.msk.msra.mxu1 %vm361_vm1, %v310_v8  ;;  %v297_v34 = vld [vmem:[%s1688_s1] sm:$0xff]  ;;  %v668_v4 = vld [vmem:[%s1404_s30 + $0x8] sm:$0xff]  ;;  %v673_v8 = vld [vmem:[%s1404_s30 + $0x30] sm:$0xff] }
  0x40   : > { %1094 = vmatprep.subr.msk.mxu1 %vm361_vm1, %v325_v9  ;;  %v670_v0 = vld [vmem:[%s1404_s30 + $0x18] sm:$0xff]  ;;  %v667_v2 = vld [vmem:[%s1404_s30] sm:$0xff]  ;;  %v672_v6 = vld [vmem:[%s1404_s30 + $0x28] sm:$0xff] }
  0x41   : > { %v671_v3 = vld [vmem:[%s1404_s30 + $0x20] sm:$0xff] }
  0x42   : > { %1034 = vmatpush3.xpose.msk.msra.mxu0 %vm361_vm1, %v309_v10 }
  0x43   : > { %1035 = vmatprep.subr.msk.mxu0 %vm361_vm1, %v324_v11  ;;  %1110 = vmatpush3.xpose.msk.msra.mxu1 %vm361_vm1, %v309_v10 }
  0x44   : > { %1095 = vmatprep.subr.msk.mxu1 %vm361_vm1, %v324_v11  ;;  %v674_v11 = vld [vmem:[%s1404_s30 + $0x38] sm:$0xff] }
  0x46   : > { %1036 = vmatpush3.xpose.msk.msra.mxu0 %vm361_vm1, %v308_v12 }
  0x47   : > { %1037 = vmatprep.subr.msk.mxu0 %vm361_vm1, %v323_v13  ;;  %1111 = vmatpush3.xpose.msk.msra.mxu1 %vm361_vm1, %v308_v12 }
  0x48   : > { %1096 = vmatprep.subr.msk.mxu1 %vm361_vm1, %v323_v13 }
  0x4a   : > { %1038 = vmatpush3.xpose.msk.msra.mxu0 %vm361_vm1, %v307_v14 }
  0x4b   : > { %1039 = vmatprep.subr.msk.mxu0 %vm361_vm1, %v322_v15  ;;  %1112 = vmatpush3.xpose.msk.msra.mxu1 %vm361_vm1, %v307_v14 }
  0x4c   : > { %1097 = vmatprep.subr.msk.mxu1 %vm361_vm1, %v322_v15  ;;  %v675_v15 = vld [vmem:[%s1404_s30 + $0x40] sm:$0xff] }
  0x4e   : > { %1040 = vmatpush3.xpose.msk.msra.mxu0 %vm361_vm1, %v306_v16 }
  0x4f   : > { %1041 = vmatprep.subr.msk.mxu0 %vm361_vm1, %v321_v17  ;;  %1113 = vmatpush3.xpose.msk.msra.mxu1 %vm361_vm1, %v306_v16 }
  0x50   : > { %1098 = vmatprep.subr.msk.mxu1 %vm361_vm1, %v321_v17 }
  0x52   : > { %1042 = vmatpush3.xpose.msk.msra.mxu0 %vm361_vm1, %v305_v18 }
  0x53   : > { %1043 = vmatprep.subr.msk.mxu0 %vm361_vm1, %v320_v19  ;;  %1114 = vmatpush3.xpose.msk.msra.mxu1 %vm361_vm1, %v305_v18 }
  0x54   : > { %1099 = vmatprep.subr.msk.mxu1 %vm361_vm1, %v320_v19  ;;  %v676_v19 = vld [vmem:[%s1404_s30 + $0x48] sm:$0xff] }
  0x56   : > { %1044 = vmatpush3.xpose.msk.msra.mxu0 %vm361_vm1, %v304_v20 }
  0x57   : > { %1045 = vmatprep.subr.msk.mxu0 %vm361_vm1, %v319_v21  ;;  %1115 = vmatpush3.xpose.msk.msra.mxu1 %vm361_vm1, %v304_v20 }
  0x58   : > { %1100 = vmatprep.subr.msk.mxu1 %vm361_vm1, %v319_v21 }
  0x5a   : > { %1046 = vmatpush3.xpose.msk.msra.mxu0 %vm361_vm1, %v303_v22 }
  0x5b   : > { %1047 = vmatprep.subr.msk.mxu0 %vm361_vm1, %v318_v23  ;;  %1116 = vmatpush3.xpose.msk.msra.mxu1 %vm361_vm1, %v303_v22  ;;  %v677_v22 = vld [vmem:[%s1404_s30 + $0x50] sm:$0xff] }
  0x5c   : > { %1101 = vmatprep.subr.msk.mxu1 %vm361_vm1, %v318_v23 }
  0x5e   : > { %1048 = vmatpush3.xpose.msk.msra.mxu0 %vm361_vm1, %v302_v24 }
  0x5f   : > { %1049 = vmatprep.subr.msk.mxu0 %vm361_vm1, %v317_v25  ;;  %1117 = vmatpush3.xpose.msk.msra.mxu1 %vm361_vm1, %v302_v24 }
  0x60   : > { %1102 = vmatprep.subr.msk.mxu1 %vm361_vm1, %v317_v25 }
  0x62   : > { %1050 = vmatpush3.xpose.msk.msra.mxu0 %vm361_vm1, %v301_v26 }
  0x63   : > { %1051 = vmatprep.subr.msk.mxu0 %vm361_vm1, %v316_v27  ;;  %1118 = vmatpush3.xpose.msk.msra.mxu1 %vm361_vm1, %v301_v26 }
  0x64   : > { %1103 = vmatprep.subr.msk.mxu1 %vm361_vm1, %v316_v27  ;;  %v678_v27 = vld [vmem:[%s1404_s30 + $0x58] sm:$0xff] }
  0x66   : > { %1052 = vmatpush3.xpose.msk.msra.mxu0 %vm361_vm1, %v300_v28 }
  0x67   : > { %1053 = vmatprep.subr.msk.mxu0 %vm361_vm1, %v315_v29  ;;  %1119 = vmatpush3.xpose.msk.msra.mxu1 %vm361_vm1, %v300_v28 }
  0x68   : > { %1104 = vmatprep.subr.msk.mxu1 %vm361_vm1, %v315_v29 }
  0x6a   : > { %1054 = vmatpush3.xpose.msk.msra.mxu0 %vm361_vm1, %v299_v30 }
  0x6b   : > { %1055 = vmatprep.subr.msk.mxu0 %vm361_vm1, %v314_v31  ;;  %1120 = vmatpush3.xpose.msk.msra.mxu1 %vm361_vm1, %v299_v30 }
  0x6c   : > { %1105 = vmatprep.subr.msk.mxu1 %vm361_vm1, %v314_v31 }
  0x6e   : > { %1056 = vmatpush3.xpose.msk.msra.mxu0 %vm361_vm1, %v298_v32 }
  0x6f   : > { %1057 = vmatprep.subr.msk.mxu0 %vm361_vm1, %v313_v33  ;;  %1121 = vmatpush3.xpose.msk.msra.mxu1 %vm361_vm1, %v298_v32  ;;  %v679_v32 = vld [vmem:[%s1404_s30 + $0x60] sm:$0xff] }
  0x70   : > { %1106 = vmatprep.subr.msk.mxu1 %vm361_vm1, %v313_v33 }
  0x72   : > { %1058 = vmatpush3.xpose.msk.msra.mxu0 %vm361_vm1, %v297_v34 }
  0x73   : > { %1122 = vmatpush3.xpose.msk.msra.mxu1 %vm361_vm1, %v297_v34 }
  0xb1   : > { %v345_v35 = vpop.trf.xlu0 }
  0xb2   : > { %1059 = vmatprep.mubr.msk.f32.mxu0 %vm361_vm1, %v345_v35 }
  0xb3   : > { %1060 = vmatmul.mubr.msk.f32.vlgmr.msra.gmra.mxu0 %vm361_vm1, %v345_v35 }
  0xb5   : > { %v346_v36 = vpop.trf.xlu0 }
  0xb6   : > { %1061 = vmatprep.mubr.msk.f32.mxu0 %vm361_vm1, %v346_v36 }
  0xb7   : > { %1062 = vmatmul.mubr.msk.f32.gmra.mxu0 %vm361_vm1, %v346_v36 }
  0xb9   : > { %v347_v37 = vpop.trf.xlu0 }
  0xba   : > { %1063 = vmatprep.mubr.msk.f32.mxu0 %vm361_vm1, %v347_v37 }
  0xbb   : > { %1064 = vmatmul.mubr.msk.f32.gmra.mxu0 %vm361_vm1, %v347_v37  ;;  %v680_v37 = vld [vmem:[%s1404_s30 + $0x68] sm:$0xff] }
  0xbd   : > { %v348_v38 = vpop.trf.xlu0 }
  0xbe   : > { %1065 = vmatprep.mubr.msk.f32.mxu0 %vm361_vm1, %v348_v38 }
  0xbf   : > { %1066 = vmatmul.mubr.msk.f32.gmra.mxu0 %vm361_vm1, %v348_v38 }
  0xc1   : > { %v349_v39 = vpop.trf.xlu0 }
  0xc2   : > { %1067 = vmatprep.mubr.msk.f32.mxu0 %vm361_vm1, %v349_v39 }
  0xc3   : > { %1068 = vmatmul.mubr.msk.f32.gmra.mxu0 %vm361_vm1, %v349_v39 }
  0xc5   : > { %v350_v40 = vpop.trf.xlu0 }
  0xc6   : > { %1069 = vmatprep.mubr.msk.f32.mxu0 %vm361_vm1, %v350_v40 }
  0xc7   : > { %1070 = vmatmul.mubr.msk.f32.gmra.mxu0 %vm361_vm1, %v350_v40 }
  0xc9   : > { %v351_v41 = vpop.trf.xlu0 }
  0xca   : > { %1071 = vmatprep.mubr.msk.f32.mxu0 %vm361_vm1, %v351_v41 }
  0xcb   : > { %1072 = vmatmul.mubr.msk.f32.gmra.mxu0 %vm361_vm1, %v351_v41  ;;  %v681_v41 = vld [vmem:[%s1404_s30 + $0x70] sm:$0xff] }
  0xcd   : > { %v352_v42 = vpop.trf.xlu0 }
  0xce   : > { %1073 = vmatprep.mubr.msk.f32.mxu0 %vm361_vm1, %v352_v42 }
  0xcf   : > { %1074 = vmatmul.mubr.msk.f32.gmra.mxu0 %vm361_vm1, %v352_v42 }
  0xd1   : > { %v353_v43 = vpop.trf.xlu0 }
  0xd2   : > { %1075 = vmatprep.mubr.msk.f32.mxu1 %vm361_vm1, %v353_v43 }
  0xd3   : > { %1076 = vmatmul.mubr.msk.f32.vlgmr.msra.gmra.mxu1 %vm361_vm1, %v353_v43 }
  0xd5   : > { %v354_v44 = vpop.trf.xlu0 }
  0xd6   : > { %1077 = vmatprep.mubr.msk.f32.mxu1 %vm361_vm1, %v354_v44 }
  0xd7   : > { %1078 = vmatmul.mubr.msk.f32.gmra.mxu1 %vm361_vm1, %v354_v44 }
  0xd9   : > { %v355_v45 = vpop.trf.xlu0 }
  0xda   : > { %1079 = vmatprep.mubr.msk.f32.mxu1 %vm361_vm1, %v355_v45 }
  0xdb   : > { %1080 = vmatmul.mubr.msk.f32.gmra.mxu1 %vm361_vm1, %v355_v45 }
  0xdd   : > { %v356_v46 = vpop.trf.xlu0 }
  0xde   : > { %1081 = vmatprep.mubr.msk.f32.mxu1 %vm361_vm1, %v356_v46 }
  0xdf   : > { %1082 = vmatmul.mubr.msk.f32.gmra.mxu1 %vm361_vm1, %v356_v46 }
  0xe1   : > { %v357_v47 = vpop.trf.xlu0 }
  0xe2   : > { %1083 = vmatprep.mubr.msk.f32.mxu1 %vm361_vm1, %v357_v47 }
  0xe3   : > { %1084 = vmatmul.mubr.msk.f32.gmra.mxu1 %vm361_vm1, %v357_v47  ;;  %v682_v47 = vld [vmem:[%s1404_s30 + $0x78] sm:$0xff] }
  0xe5   : > { %v358_v48 = vpop.trf.xlu0 }
  0xe6   : > { %1085 = vmatprep.mubr.msk.f32.mxu1 %vm361_vm1, %v358_v48 }
  0xe7   : > { %1086 = vmatmul.mubr.msk.f32.gmra.mxu1 %vm361_vm1, %v358_v48 }
  0xe9   : > { %v359_v49 = vpop.trf.xlu0 }
  0xea   : > { %1087 = vmatprep.mubr.msk.f32.mxu1 %vm361_vm1, %v359_v49 }
  0xeb   : > { %1088 = vmatmul.mubr.msk.f32.gmra.mxu1 %vm361_vm1, %v359_v49 }
  0xed   : > { %v360_v50 = vpop.trf.xlu0 }
  0xee   : > { %1089 = vmatprep.mubr.msk.f32.mxu1 %vm361_vm1, %v360_v50 }
  0xef   : > { %1090 = vmatmul.mubr.msk.f32.gmra.mxu1 %vm361_vm1, %v360_v50 }
 0x173   : > { %v572_v51 = vpop.f32.mrf.mxu0 }
 0x174   : > { %v699_v9 = vadd.f32 %v667_v2, %v572_v51  ;;  %v683_v51 = vld [vmem:[%s1404_s30 + $0x80] sm:$0xff] }
 0x175   : > { %v574_v52 = vpop.f32.mrf.mxu0 }
 0x176   : > { %v700_v13 = vadd.f32 %v668_v4, %v574_v52  ;;  %v732_v24 = vmul.f32 %v699_v9, %v699_v9 }
 0x177   : > { %v578_v53 = vpop.f32.mrf.mxu0 }
 0x178   : > { %v701_v5 = vadd.f32 %v669_v63, %v578_v53  ;;  %v733_v29 = vmul.f32 %v700_v13, %v700_v13 }
 0x179   : > { %v580_v54 = vpop.f32.mrf.mxu0 }
 0x17a   : > { %v702_v7 = vadd.f32 %v670_v0, %v580_v54  ;;  %v734_v17 = vmul.f32 %v701_v5, %v701_v5  ;;  %v687_v5 = vld [vmem:[%s1404_s30 + $0xa0] sm:$0xff] }
 0x17b   : > { %v584_v55 = vpop.f32.mrf.mxu0 }
 0x17c   : > { %v703_v10 = vadd.f32 %v671_v3, %v584_v55  ;;  %v735_v20 = vmul.f32 %v702_v7, %v702_v7  ;;  %v764_v34 = vadd.f32 %v734_v17, %v732_v24  ;;  %v691_v24 = vld [vmem:[%s1404_s30 + $0xc0] sm:$0xff] }
 0x17d   : > { %v586_v56 = vpop.f32.mrf.mxu0 }
 0x17e   : > { %v704_v14 = vadd.f32 %v672_v6, %v586_v56  ;;  %v736_v25 = vmul.f32 %v703_v10, %v703_v10  ;;  %v785_v38 = vadd.f32 %v735_v20, %v733_v29  ;;  %v684_v56 = vld [vmem:[%s1404_s30 + $0x88] sm:$0xff] }
 0x17f   : > { %v590_v57 = vpop.f32.mrf.mxu0  ;;  %v688_v10 = vld [vmem:[%s1404_s30 + $0xa8] sm:$0xff] }
 0x180   : > { %v705_v18 = vadd.f32 %v673_v8, %v590_v57  ;;  %v737_v30 = vmul.f32 %v704_v14, %v704_v14  ;;  %v765_v43 = vadd.f32 %v764_v34, %v736_v25  ;;  %v689_v14 = vld [vmem:[%s1404_s30 + $0xb0] sm:$0xff] }
 0x181   : > { %v592_v58 = vpop.f32.mrf.mxu0 }
 0x182   : > { %v706_v21 = vadd.f32 %v674_v11, %v592_v58  ;;  %v738_v35 = vmul.f32 %v705_v18, %v705_v18  ;;  %v786_v48 = vadd.f32 %v785_v38, %v737_v30 }
 0x183   : > { %v596_v59 = vpop.f32.mrf.mxu0 }
 0x184   : > { %v707_v26 = vadd.f32 %v675_v15, %v596_v59  ;;  %v739_v39 = vmul.f32 %v706_v21, %v706_v21  ;;  %v766_v53 = vadd.f32 %v765_v43, %v738_v35 }
 0x185   : > { %v598_v60 = vpop.f32.mrf.mxu0 }
 0x186   : > { %v708_v31 = vadd.f32 %v676_v19, %v598_v60  ;;  %v740_v44 = vmul.f32 %v707_v26, %v707_v26  ;;  %v787_v57 = vadd.f32 %v786_v48, %v739_v39  ;;  %v685_v60 = vld [vmem:[%s1404_s30 + $0x90] sm:$0xff]  ;;  %v690_v19 = vld [vmem:[%s1404_s30 + $0xb8] sm:$0xff]  ;;  %v695_v48 = vld [vmem:[%s1404_s30 + $0xe0] sm:$0xff] }
 0x187   : > { %v602_v61 = vpop.f32.mrf.mxu0 }
 0x188   : > { %v709_v36 = vadd.f32 %v677_v22, %v602_v61  ;;  %v741_v49 = vmul.f32 %v708_v31, %v708_v31 }
 0x189   : > { %v604_v62 = vpop.f32.mrf.mxu0 }
 0x18a   : > { %v710_v40 = vadd.f32 %v678_v27, %v604_v62  ;;  %v742_v54 = vmul.f32 %v709_v36, %v709_v36  ;;  %v767_v62 = vadd.f32 %v766_v53, %v740_v44  ;;  %v788_v2 = vadd.f32 %v787_v57, %v741_v49 }
 0x18b   : > { %v608_v1 = vpop.f32.mrf.mxu0 }
 0x18c   : > { %v711_v45 = vadd.f32 %v679_v32, %v608_v1  ;;  %v743_v58 = vmul.f32 %v710_v40, %v710_v40  ;;  %v686_v1 = vld [vmem:[%s1404_s30 + $0x98] sm:$0xff]  ;;  %v768_v7 = vadd.f32 %v767_v62, %v742_v54  ;;  %v692_v32 = vld [vmem:[%s1404_s30 + $0xc8] sm:$0xff] }
 0x18d   : > { %v610_v12 = vpop.f32.mrf.mxu0  ;;  %v694_v40 = vld [vmem:[%s1404_s30 + $0xd8] sm:$0xff]  ;;  %v696_v54 = vld [vmem:[%s1404_s30 + $0xe8] sm:$0xff] }
 0x18e   : > { %v712_v50 = vadd.f32 %v680_v37, %v610_v12  ;;  %v744_v63 = vmul.f32 %v711_v45, %v711_v45  ;;  %v789_v11 = vadd.f32 %v788_v2, %v743_v58 }
 0x18f   : > { %v614_v28 = vpop.f32.mrf.mxu0 }
 0x190   : > { %v713_v55 = vadd.f32 %v681_v41, %v614_v28  ;;  %v745_v3 = vmul.f32 %v712_v50, %v712_v50  ;;  %v769_v17 = vadd.f32 %v768_v7, %v744_v63 }
 0x191   : > { %v616_v46 = vpop.f32.mrf.mxu0 }
 0x192   : > { %v714_v59 = vadd.f32 %v682_v47, %v616_v46  ;;  %v746_v8 = vmul.f32 %v713_v55, %v713_v55  ;;  %v790_v20 = vadd.f32 %v789_v11, %v745_v3  ;;  %v698_v3 = vld [vmem:[%s1404_s30 + $0xf8] sm:$0xff] }
 0x193   : > { %v620_v16 = vpop.f32.mrf.mxu1 }
 0x194   : > { %v715_v0 = vadd.f32 %v683_v51, %v620_v16  ;;  %v747_v12 = vmul.f32 %v714_v59, %v714_v59  ;;  %v770_v25 = vadd.f32 %v769_v17, %v746_v8 }
 0x195   : > { %v622_v23 = vpop.f32.mrf.mxu1 }
 0x196   : > { %v716_v4 = vadd.f32 %v684_v56, %v622_v23  ;;  %v748_v16 = vmul.f32 %v715_v0, %v715_v0  ;;  %v791_v28 = vadd.f32 %v790_v20, %v747_v12 }
 0x197   : > { %v626_v33 = vpop.f32.mrf.mxu1 }
 0x198   : > { %v717_v9 = vadd.f32 %v685_v60, %v626_v33  ;;  %v749_v21 = vmul.f32 %v716_v4, %v716_v4  ;;  %v693_v33 = vld [vmem:[%s1404_s30 + $0xd0] sm:$0xff]  ;;  %v771_v34 = vadd.f32 %v770_v25, %v748_v16 }
 0x199   : > { %v628_v42 = vpop.f32.mrf.mxu1 }
 0x19a   : > { %v718_v13 = vadd.f32 %v686_v1, %v628_v42  ;;  %v750_v26 = vmul.f32 %v717_v9, %v717_v9  ;;  %v792_v37 = vadd.f32 %v791_v28, %v749_v21 }
 0x19b   : > { %v632_v52 = vpop.f32.mrf.mxu1 }
 0x19c   : > { %v719_v18 = vadd.f32 %v687_v5, %v632_v52  ;;  %v751_v29 = vmul.f32 %v718_v13, %v718_v13  ;;  %v772_v41 = vadd.f32 %v771_v34, %v750_v26 }
 0x19d   : > { %v634_v61 = vpop.f32.mrf.mxu1 }
 0x19e   : > { %v720_v22 = vadd.f32 %v688_v10, %v634_v61  ;;  %v752_v35 = vmul.f32 %v719_v18, %v719_v18  ;;  %v793_v45 = vadd.f32 %v792_v37, %v751_v29  ;;  %v697_v61 = vld [vmem:[%s1404_s30 + $0xf0] sm:$0xff]  ;;  %v731_v37 = vld [vmem:[#allocation2] sm:$0x3] }
 0x19f   : > { %v638_v6 = vpop.f32.mrf.mxu1 }
 0x1a0   : > { %v721_v27 = vadd.f32 %v689_v14, %v638_v6  ;;  %v753_v38 = vmul.f32 %v720_v22, %v720_v22  ;;  %v773_v49 = vadd.f32 %v772_v41, %v752_v35  ;;  %v1306_v22 = vmov 1966171168  }
 0x1a1   : > { %v640_v15 = vpop.f32.mrf.mxu1 }
 0x1a2   : > { %v722_v30 = vadd.f32 %v690_v19, %v640_v15  ;;  %v754_v42 = vmul.f32 %v721_v27, %v721_v27  ;;  %v794_v52 = vadd.f32 %v793_v45, %v753_v38 }
 0x1a3   : > { %v644_v23 = vpop.f32.mrf.mxu1 }
 0x1a4   : > { %v723_v36 = vadd.f32 %v691_v24, %v644_v23  ;;  %v755_v46 = vmul.f32 %v722_v30, %v722_v30  ;;  %v774_v55 = vadd.f32 %v773_v49, %v754_v42  ;;  %v810_v23 = vunpack.c.l.s4 %v1306_v22 }
 0x1a5   : > { %v646_v31 = vpop.f32.mrf.mxu1  ;;  %v812_v24 = vlaneseq }
 0x1a6   : > { %v724_v43 = vadd.f32 %v692_v32, %v646_v31  ;;  %v756_v50 = vmul.f32 %v723_v36, %v723_v36  ;;  %v795_v59 = vadd.f32 %v794_v52, %v755_v46  ;;  %v811_v29 = vunpack.c.0.s8 %v810_v23 }
 0x1a7   : > { %v650_v39 = vpop.f32.mrf.mxu1  ;;  %v813_v30 = vshrl.u32 %v812_v24, 7  ;;  %vm1640_vm2 = vcmp.lt.s32.totalorder %v812_v24, 256 }
 0x1a8   : > { %v725_v44 = vadd.f32 %v693_v33, %v650_v39  ;;  %v757_v56 = vmul.f32 %v724_v43, %v724_v43  ;;  %v775_v62 = vadd.f32 %v774_v55, %v756_v50 }
 0x1a9   : > { %v652_v47 = vpop.f32.mrf.mxu1  ;;  %v814_v34 = vsub.s32 %v811_v29, %v813_v30 }
 0x1aa   : > { %v726_v51 = vadd.f32 %v694_v40, %v652_v47  ;;  %v758_v57 = vmul.f32 %v725_v44, %v725_v44  ;;  %v796_v4 = vadd.f32 %v795_v59, %v757_v56 }
 0x1ab   : > { %v656_v53 = vpop.f32.mrf.mxu1 }
 0x1ac   : > { %v727_v58 = vadd.f32 %v695_v48, %v656_v53  ;;  %v759_v63 = vmul.f32 %v726_v51, %v726_v51  ;;  %v776_v5 = vadd.f32 %v775_v62, %v758_v57 }
 0x1ad   : > { %v658_v60 = vpop.f32.mrf.mxu1 }
 0x1ae   : > { %v760_v0 = vmul.f32 %v727_v58, %v727_v58  ;;  %v728_v1 = vadd.f32 %v696_v54, %v658_v60  ;;  %v797_v9 = vadd.f32 %v796_v4, %v759_v63 }
 0x1af   : > { %v662_v2 = vpop.f32.mrf.mxu1 }
 0x1b0   : > { %v761_v6 = vmul.f32 %v728_v1, %v728_v1  ;;  %v729_v7 = vadd.f32 %v697_v61, %v662_v2  ;;  %v777_v10 = vadd.f32 %v776_v5, %v760_v0 }
 0x1b1   : > { %v664_v8 = vpop.f32.mrf.mxu1 }
 0x1b2   : > { %v762_v11 = vmul.f32 %v729_v7, %v729_v7  ;;  %v730_v12 = vadd.f32 %v698_v3, %v664_v8  ;;  %v798_v13 = vadd.f32 %v797_v9, %v761_v6 }
 0x1b4   : > { %v778_v14 = vadd.f32 %v777_v10, %v762_v11  ;;  %v763_v15 = vmul.f32 %v730_v12, %v730_v12 }
 0x1b6   : > { %v779_v17 = vrot.slane %v778_v14, 4  ;;  %v799_v16 = vadd.f32 %v798_v13, %v763_v15 }
 0x1b8   : > { %v780_v18 = vadd.f32 %v779_v17, %v778_v14  ;;  %v800_v19 = vrot.slane %v799_v16, 4 }
 0x1ba   : > { %v781_v20 = vrot.slane %v780_v18, 2  ;;  %v801_v21 = vadd.f32 %v800_v19, %v799_v16 }
 0x1bc   : > { %v782_v25 = vadd.f32 %v781_v20, %v780_v18  ;;  %v802_v26 = vrot.slane %v801_v21, 2 }
 0x1be   : > { %v783_v27 = vrot.slane %v782_v25, 1  ;;  %v803_v28 = vadd.f32 %v802_v26, %v801_v21 }
 0x1c0   : > { %v804_v31 = vrot.slane %v803_v28, 1  ;;  %v784_v32 = vadd.f32 %v783_v27, %v782_v25 }
 0x1c2   : > { %v805_v33 = vadd.f32 %v804_v31, %v803_v28 }
 0x1c4   : > { %v808_v35 = vcombine.low %v784_v32, %v805_v33 }
 0x1c6   : > { %v815_v36 = vrot.slane %v808_v35, %v814_v34 }
 0x1c8   : > { %v822_v38 = vrot.slane %v815_v36, %v814_v34  ;;  %833 = sbr.rel (%p1020_p7) target bundleno = 503 (0x1f7), region = 48 }
 0x1ca   : > { %v824_v40 = vadd.f32 %v822_v38, %v731_v37 }
 0x1cc   : > { %829 = vst.msk [vmem:[#allocation2] sm:$0x3] %vm1640_vm2, %v824_v40 }
 0x1cd   : > { %v834_v47 = vld [vmem:[%s1690_s3] sm:$0x3] }
 0x1d3   : > { %v835_v41 = vld [vmem:[#allocation2] sm:$0x3] }
 0x1d4   : > { %1190 = vrsqrt.f32 %v835_v41  ;;  %vm838_vm3 = vcmp.eq.f32.partialorder %v835_v41, inf  ;;  %v841_v43 = vand.u32 2147483648, %v835_v41  ;;  %vm840_vm4 = vcmp.eq.f32.partialorder %v835_v41, 0.0 }
 0x1e1   : > { %v1191_v42 = vpop.eup %1190 }
 0x1e2   : > { %v837_v44 = vmul.f32 %v1191_v42, %v835_v41 }
 0x1e4   : > { %v839_v45 = vsel %vm838_vm3, %v835_v41, %v837_v44 }
 0x1e5   : > { %v842_v46 = vsel %vm840_vm4, %v841_v43, %v839_v45 }
 0x1e6   : > { %1192 = vrcp.f32 %v842_v46 }
 0x1f3   : > { %v1193_v48 = vpop.eup %1192 }
 0x1f4   : > { %v844_v49 = vmul.f32 %v1193_v48, %v834_v47 }
 0x1f6   : > { %845 = vst.msk [vmem:[#allocation6] sm:$0x3] %vm1640_vm2, %v844_v49 }
 0x1f7 PF: > { %p1654_p10 = scmp.eq.s32.totalorder %s959_s21, 1  ;;  %s1307_s7 = smov [#allocation6]  }
 0x1f8   : > { %s856_s8 = sshll.u32 %s1307_s7, 4  ;;  %s857_s8 = int_to_ptr.vmem [resolvable:$true] %s856_s8 }
 0x1f9   : > { %s1222_s9 = scalar_lea.vmem %s857_s8, 32  ;;  %p1229_p0 = scmp.lt.s32.totalorder %s857_s8, %s857_s8 }
 0x1fa   : > { %p1223_p11 = scmp.ne.s32.totalorder %s857_s8, %s1222_s9  ;;  %p1230_p1 = scmp.lt.s32.totalorder %s1222_s9, %s1222_s9 }
 0x1fc   : > { %p1224_p12 = pnand %p1223_p11, %p1654_p10  ;;  %p1231_p2 = por %p1230_p1, %p1229_p0 }
 0x1fe   : > { %p1225_p13 = pneg %p1224_p12 }
 0x200   : > { %p1232_p3 = pnand %p1231_p2, %p1225_p13 }
 0x202   : > { %1235 = shalt.err (!%p1232_p3)
}
 0x203   : > { %1126 = dma.vmem_to_hbm [thread:$0]  (%p1654_p10), %s857_s8, 32, %s1691_s4, [#allocation5]  }
 0x204   : > { %1275 = dma.done.wait (%p1654_p10), [#allocation5], 32  }
 0x205   : > { %1277 = vsyncadd (%p1654_p10), [#allocation5], 4294967264 }
 0x206 PF: > { %s18_s20 = sadd.s32 1, %s1300_s20   ;;  %s1698_s15 = smov %s1284_s16 }
 0x207   : > { %p15_p4 = scmp.ge.s32.totalorder %s18_s20, 4   ;;  %s1699_s16 = smov %s1288_s17 }
 0x208   : > { %s1700_s17 = smov %s1384_s27  ;;  %s1701_s18 = smov %s1296_s19 }
 0x209   : > { %s1702_s19 = smov %s1704_s22  ;;  %17 = sbr.rel (!%p15_p4) target bundleno = 5 (0x5), region = 91 }
 0x20e   :  { %869 = vsyncpa [#allocation4], 1 }
 0x20f   :  { %871 = vsyncpa [#allocation4 + $0x1], 1 }
 0x210   :  { %872 = vsyncpa [#allocation5], 1 }
 0x211   :  { %874 = vsyncpa [#allocation5 + $0x1], 1 }

</bundles_post_ra>
